<compile_context>
chip_gen: v7x
topology: tpu7x:2x2x1
jax: 0.10.0
libtpu: 0.0.40
codegen_flags: <defaults>
</compile_context>

<pallas_src>
import functools
import math

import jax
import jax.numpy as jnp
from jax.experimental import pallas as pl
from jax.experimental.pallas import tpu as pltpu

# Large finite negative used instead of -inf for masking / m-init: still
# underflows to 0 inside softmax, but can never produce exp(-inf - -inf) = NaN.
_MASK_VALUE = -0.7 * float(jnp.finfo(jnp.float32).max)


# --------------------------------------------------------------------------- #
# Pass 1: fused QKV projection (+ scale folded into Q) + head split.          #
# --------------------------------------------------------------------------- #
def _qkv_proj_kernel(x_ref, w_ref, b_ref, q_ref, k_ref, v_ref, *,
                     n_heads, d_head):
    """x_ref: (1, ts, D); w_ref: (D, 3D) pre-transposed/pre-scaled;
    b_ref: (1, 3D); q/k/v_ref: (1, H, ts, d_head) compute-dtype outputs."""
    ts = x_ref.shape[1]
    d_embed = n_heads * d_head
    x = x_ref[0]
    qkv = jnp.dot(x, w_ref[...], preferred_element_type=jnp.float32)
    qkv = (qkv + b_ref[0].astype(jnp.float32)).astype(q_ref.dtype)

    def heads(t):                        # (ts, D) -> (H, ts, d_head)
        return t.reshape(ts, n_heads, d_head).transpose(1, 0, 2)

    # Head-split relayout is paid once per token here instead of once per
    # (q_tile, kv_tile) pair inside the attention inner loop.
    q_ref[0] = heads(qkv[:, 0 * d_embed:1 * d_embed])
    k_ref[0] = heads(qkv[:, 1 * d_embed:2 * d_embed])
    v_ref[0] = heads(qkv[:, 2 * d_embed:3 * d_embed])


# --------------------------------------------------------------------------- #
# Pass 2: flash attention (online softmax) + fused output projection.         #
# --------------------------------------------------------------------------- #
def _flash_attn_kernel(q_ref, k_ref, v_ref, wo_ref, bo_ref, o_ref,
                       m_scr, l_scr, acc_scr, *, tq, tk, causal, bf16_exp):
    qi = pl.program_id(1)
    ki = pl.program_id(2)
    nk = pl.num_programs(2)
    cdtype = q_ref.dtype
    exp_dtype = jnp.bfloat16 if bf16_exp else jnp.float32

    @pl.when(ki == 0)
    def _init():
        m_scr[...] = jnp.full(m_scr.shape, _MASK_VALUE, dtype=m_scr.dtype)
        l_scr[...] = jnp.zeros(l_scr.shape, dtype=l_scr.dtype)
        acc_scr[...] = jnp.zeros(acc_scr.shape, dtype=acc_scr.dtype)

    def _update():
        q = q_ref[0]                                   # (H, tq, dh), pre-scaled
        k = k_ref[0]                                   # (H, tk, dh)
        v = v_ref[0]                                   # (H, tk, dh)
        s = jnp.einsum('hqd,hkd->hqk', q, k,
                       preferred_element_type=jnp.float32)
        if causal:
            row = qi * tq + jax.lax.broadcasted_iota(jnp.int32, (tq, tk), 0)
            col = ki * tk + jax.lax.broadcasted_iota(jnp.int32, (tq, tk), 1)
            s = jnp.where((col > row)[None, :, :], _MASK_VALUE, s)

        m_prev = m_scr[...]
        m_new = jnp.maximum(m_prev, jnp.max(s, axis=-1, keepdims=True))
        alpha = jnp.exp(m_prev - m_new)
        # exp in bf16 when compute dtype is bf16 (EUP-bound at SD head dims);
        # the row-sum and m/l bookkeeping stay in f32.
        p = jnp.exp((s - m_new).astype(exp_dtype))
        l_scr[...] = alpha * l_scr[...] + jnp.sum(
            p.astype(jnp.float32), axis=-1, keepdims=True)
        acc_scr[...] = alpha * acc_scr[...] + jnp.einsum(
            'hqk,hkd->hqd', p.astype(cdtype), v,
            preferred_element_type=jnp.float32)
        m_scr[...] = m_new

    if causal:
        # Only kv tiles intersecting the causal triangle do any work.
        pl.when(ki * tk <= qi * tq + tq - 1)(_update)
    else:
        _update()

    @pl.when(ki == nk - 1)
    def _finalize():
        n_heads, _, d_head = acc_scr.shape
        out = acc_scr[...] / l_scr[...]                # exact normalization
        out = out.transpose(1, 0, 2).reshape(tq, n_heads * d_head)  # once/q-tile
        y = jnp.dot(out.astype(cdtype), wo_ref[...],
                    preferred_element_type=jnp.float32)
        y = y + bo_ref[0].astype(jnp.float32)
        o_ref[0] = y.astype(o_ref.dtype)


# --------------------------------------------------------------------------- #
# Wrapper.                                                                    #
# --------------------------------------------------------------------------- #
def _round_up(x, m):
    return (x + m - 1) // m * m


def _padded_vmem_bytes(shape, dtype, buffers=1):
    """Padded VMEM footprint of a block (last dim -> 128, 2nd-last -> 8)."""
    s = list(shape)
    if len(s) >= 1:
        s[-1] = _round_up(s[-1], 128)
    if len(s) >= 2:
        s[-2] = _round_up(s[-2], 8)
    return int(math.prod(s)) * jnp.dtype(dtype).itemsize * buffers


def _vmem_limit_bytes(working_set_bytes):
    """Scoped-VMEM limit sized from the working set, capped below capacity."""
    cap = 64 * 1024 * 1024
    try:
        cap = int(pltpu.get_tpu_info().vmem_capacity_bytes)
    except Exception:
        pass
    cap = max(cap, 64 * 1024 * 1024)
    want = int(working_set_bytes * 1.25) + (4 << 20)   # headroom for compiler temps
    return int(min(max(want, 32 << 20), (cap * 7) // 8))


def self_attention(x, w_in, b_in, w_out, b_out, n_heads, causal_mask=False,
                   q_tile=None, k_tile=None, proj_tile=None):
    """x: (B, S, D). Weights in PyTorch nn.Linear layout:
    w_in (3D, D), b_in (3D,), w_out (D, D), b_out (D,)."""
    B, S, D = x.shape
    assert D % n_heads == 0
    d_head = D // n_heads
    cdtype = x.dtype

    # Tile selection.
    # TODO(synk): pad S to a tile multiple for sequence lengths that do not
    # divide evenly (e.g. the 77-token text-encoder sequence).
    def _pick(pref, cur):
        if cur is not None:
            return cur
        return pref if (S > pref and S % pref == 0) else S

    q_tile = _pick(256, q_tile)
    k_tile = _pick(256, k_tile)
    proj_tile = _pick(256, proj_tile)
    assert S % q_tile == 0 and S % k_tile == 0 and S % proj_tile == 0

    # One-time weight prep (wrapper-side layout plumbing, not compute):
    # transpose to "x @ W" layout, cast to the compute dtype, and fold
    # 1/sqrt(d_head) into the Q columns of the in-projection weight/bias.
    scale = 1.0 / math.sqrt(d_head)
    col_scale = jnp.concatenate([
        jnp.full((D,), scale, dtype=jnp.float32),
        jnp.ones((2 * D,), dtype=jnp.float32)])
    w_in_t = (jnp.transpose(w_in).astype(jnp.float32) * col_scale).astype(cdtype)
    b_in_s = (b_in.astype(jnp.float32) * col_scale).reshape(1, 3 * D).astype(cdtype)
    wo_t = jnp.transpose(w_out).astype(cdtype)             # (D, D)
    bo = b_out.reshape(1, D).astype(cdtype)

    # ----------------- pass 1: QKV projection + head split ----------------- #
    qkv_shape = jax.ShapeDtypeStruct((B, n_heads, S, d_head), cdtype)
    proj_ws = (
        _padded_vmem_bytes((1, proj_tile, D), cdtype, buffers=2)
        + _padded_vmem_bytes((D, 3 * D), cdtype, buffers=2)
        + _padded_vmem_bytes((1, 3 * D), cdtype, buffers=2)
        + 3 * _padded_vmem_bytes((1, n_heads, proj_tile, d_head), cdtype, buffers=2)
        + _padded_vmem_bytes((proj_tile, 3 * D), jnp.float32))     # f32 temporaries

    q_hs, k_hs, v_hs = pl.pallas_call(
        functools.partial(_qkv_proj_kernel, n_heads=n_heads, d_head=d_head),
        out_shape=(qkv_shape, qkv_shape, qkv_shape),
        grid=(B, S // proj_tile),
        in_specs=[
            pl.BlockSpec((1, proj_tile, D), lambda b, si: (b, si, 0)),
            pl.BlockSpec((D, 3 * D), lambda b, si: (0, 0)),
            pl.BlockSpec((1, 3 * D), lambda b, si: (0, 0)),
        ],
        out_specs=(
            pl.BlockSpec((1, n_heads, proj_tile, d_head), lambda b, si: (b, 0, si, 0)),
            pl.BlockSpec((1, n_heads, proj_tile, d_head), lambda b, si: (b, 0, si, 0)),
            pl.BlockSpec((1, n_heads, proj_tile, d_head), lambda b, si: (b, 0, si, 0)),
        ),
        compiler_params=pltpu.CompilerParams(
            dimension_semantics=("parallel", "parallel"),
            vmem_limit_bytes=_vmem_limit_bytes(proj_ws)),
    )(x, w_in_t, b_in_s)

    # --------------- pass 2: flash attention + fused out_proj --------------- #
    nq, nk = S // q_tile, S // k_tile

    if causal_mask:
        def kv_index(b, qi, ki):
            # Clamp above-diagonal steps to the last useful kv block so Pallas
            # skips the DMA (their compute is skipped with pl.when in-kernel).
            last = ((qi + 1) * q_tile - 1) // k_tile
            return (b, 0, jnp.minimum(ki, last), 0)
    else:
        def kv_index(b, qi, ki):
            return (b, 0, ki, 0)

    attn_ws = (
        _padded_vmem_bytes((1, n_heads, q_tile, d_head), cdtype, buffers=2)
        + 2 * _padded_vmem_bytes((1, n_heads, k_tile, d_head), cdtype, buffers=2)
        + _padded_vmem_bytes((D, D), cdtype, buffers=2)
        + _padded_vmem_bytes((1, D), cdtype, buffers=2)
        + _padded_vmem_bytes((1, q_tile, D), cdtype, buffers=2)
        + _padded_vmem_bytes((n_heads, q_tile, d_head), jnp.float32)   # acc
        + 2 * _padded_vmem_bytes((n_heads, q_tile, 1), jnp.float32)    # m, l
        + 2 * _padded_vmem_bytes((n_heads, q_tile, k_tile), jnp.float32))  # s, p

    kernel = functools.partial(
        _flash_attn_kernel, tq=q_tile, tk=k_tile, causal=causal_mask,
        bf16_exp=(jnp.dtype(cdtype) == jnp.dtype(jnp.bfloat16)))

    return pl.pallas_call(
        kernel,
        out_shape=jax.ShapeDtypeStruct((B, S, D), cdtype),
        grid=(B, nq, nk),
        in_specs=[
            pl.BlockSpec((1, n_heads, q_tile, d_head), lambda b, qi, ki: (b, 0, qi, 0)),
            pl.BlockSpec((1, n_heads, k_tile, d_head), kv_index),
            pl.BlockSpec((1, n_heads, k_tile, d_head), kv_index),
            pl.BlockSpec((D, D), lambda b, qi, ki: (0, 0)),
            pl.BlockSpec((1, D), lambda b, qi, ki: (0, 0)),
        ],
        out_specs=pl.BlockSpec((1, q_tile, D), lambda b, qi, ki: (b, qi, 0)),
        scratch_shapes=[
            pltpu.VMEM((n_heads, q_tile, 1), jnp.float32),        # running max m
            pltpu.VMEM((n_heads, q_tile, 1), jnp.float32),        # running denom l
            pltpu.VMEM((n_heads, q_tile, d_head), jnp.float32),   # running acc
        ],
        compiler_params=pltpu.CompilerParams(
            dimension_semantics=("parallel", "parallel", "arbitrary"),
            vmem_limit_bytes=_vmem_limit_bytes(attn_ws)),
    )(q_hs, k_hs, v_hs, wo_t, bo)


# --------------------------------------------------------------------------- #
# Pure-JAX reference replicating the PyTorch forward exactly.                 #
# --------------------------------------------------------------------------- #
def _reference(x, w_in, b_in, w_out, b_out, n_heads, causal_mask=False):
    B, S, D = x.shape
    d_head = D // n_heads
    qkv = x @ w_in.T + b_in
    q, k, v = jnp.split(qkv, 3, axis=-1)

    def to_heads(t):
        return t.reshape(B, S, n_heads, d_head).transpose(0, 2, 1, 3)

    q, k, v = to_heads(q), to_heads(k), to_heads(v)
    w = q @ jnp.swapaxes(k, -1, -2)
    if causal_mask:
        mask = jnp.triu(jnp.ones((S, S), dtype=bool), 1)
        w = jnp.where(mask, -jnp.inf, w)
    w = w / math.sqrt(d_head)
    w = jax.nn.softmax(w, axis=-1)
    out = w @ v
    out = out.transpose(0, 2, 1, 3).reshape(B, S, D)
    return out @ w_out.T + b_out


if __name__ == "__main__":
    H = 4
    key = jax.random.PRNGKey(0)
    kx, kw1, kb1, kw2, kb2 = jax.random.split(key, 5)

    ok = True
    # (B, S, D, q_tile, k_tile): single-tile case at the module's nominal small
    # shape, plus a multi-tile case exercising the online-softmax / causal
    # tile-skip / DMA-clamp paths.
    for (B, S, D, tq, tk) in ((2, 8, 32, None, None), (2, 16, 32, 8, 8)):
        x = jax.random.normal(kx, (B, S, D), dtype=jnp.float32)
        w_in = jax.random.normal(kw1, (3 * D, D), dtype=jnp.float32) * 0.05
        b_in = jax.random.normal(kb1, (3 * D,), dtype=jnp.float32) * 0.05
        w_out = jax.random.normal(kw2, (D, D), dtype=jnp.float32) * 0.05
        b_out = jax.random.normal(kb2, (D,), dtype=jnp.float32) * 0.05

        for causal in (False, True):
            y = self_attention(x, w_in, b_in, w_out, b_out, H,
                               causal_mask=causal, q_tile=tq, k_tile=tk,
                               proj_tile=tq)
            jax.block_until_ready(y)
            y_ref = _reference(x, w_in, b_in, w_out, b_out, H, causal_mask=causal)
            ok = ok and bool(jnp.allclose(y, y_ref, atol=2e-3, rtol=2e-3))

    # bf16 smoke test (production dtype; exercises the bf16-exp path) at the
    # single-tile shape, compared against an f32 reference on the same
    # bf16-rounded inputs with a bf16-appropriate tolerance.
    B, S, D = 2, 8, 32
    xb = jax.random.normal(kx, (B, S, D), dtype=jnp.float32).astype(jnp.bfloat16)
    w_inb = (jax.random.normal(kw1, (3 * D, D), dtype=jnp.float32) * 0.05).astype(jnp.bfloat16)
    b_inb = (jax.random.normal(kb1, (3 * D,), dtype=jnp.float32) * 0.05).astype(jnp.bfloat16)
    w_outb = (jax.random.normal(kw2, (D, D), dtype=jnp.float32) * 0.05).astype(jnp.bfloat16)
    b_outb = (jax.random.normal(kb2, (D,), dtype=jnp.float32) * 0.05).astype(jnp.bfloat16)
    for causal in (False, True):
        yb = self_attention(xb, w_inb, b_inb, w_outb, b_outb, H, causal_mask=causal)
        jax.block_until_ready(yb)
        yb_ref = _reference(xb.astype(jnp.float32), w_inb.astype(jnp.float32),
                            b_inb.astype(jnp.float32), w_outb.astype(jnp.float32),
                            b_outb.astype(jnp.float32), H, causal_mask=causal)
        ok = ok and bool(jnp.allclose(yb.astype(jnp.float32), yb_ref,
                                      atol=5e-2, rtol=5e-2))

    if ok:
        print("KERNEL_OK")
</pallas_src>

<mosaic_0001>
module attributes {stable_mosaic.version = 11 : i64} {
  func.func @_qkv_proj_kernel(%arg0: i32, %arg1: i32, %arg2: memref<1x8x32xf32, #tpu.memory_space<vmem>>, %arg3: memref<32x96xf32, #tpu.memory_space<vmem>>, %arg4: memref<1x96xf32, #tpu.memory_space<vmem>>, %arg5: memref<1x4x8x8xf32, #tpu.memory_space<vmem>>, %arg6: memref<1x4x8x8xf32, #tpu.memory_space<vmem>>, %arg7: memref<1x4x8x8xf32, #tpu.memory_space<vmem>>) attributes {dimension_semantics = [#tpu.dimension_semantics<parallel>, #tpu.dimension_semantics<parallel>], iteration_bounds = array<i64: 2, 1>, scalar_prefetch = 0 : i64, scratch_operands = 0 : i64, tpu.core_type = #tpu.core_type<tc>, window_params = [{transform_indices = @transform_0, window_bounds = array<i64: 1, 8, 32>}, {pipeline_mode = #tpu.pipeline_mode<synchronous>, transform_indices = @transform_1, window_bounds = array<i64: 32, 96>}, {pipeline_mode = #tpu.pipeline_mode<synchronous>, transform_indices = @transform_2, window_bounds = array<i64: 1, 96>}, {transform_indices = @transform_3, window_bounds = array<i64: 1, 4, 8, 8>}, {transform_indices = @transform_4, window_bounds = array<i64: 1, 4, 8, 8>}, {transform_indices = @transform_5, window_bounds = array<i64: 1, 4, 8, 8>}]} {
    %c0 = arith.constant 0 : index
    %c0_0 = arith.constant 0 : index
    %c0_1 = arith.constant 0 : index
    %0 = vector.load %arg2[%c0, %c0_0, %c0_1] : memref<1x8x32xf32, #tpu.memory_space<vmem>>, vector<1x8x32xf32>
    %1 = vector.shape_cast %0 : vector<1x8x32xf32> to vector<8x32xf32>
    %c0_2 = arith.constant 0 : index
    %c0_3 = arith.constant 0 : index
    %2 = vector.load %arg3[%c0_2, %c0_3] : memref<32x96xf32, #tpu.memory_space<vmem>>, vector<32x96xf32>
    %cst = arith.constant dense<0.000000e+00> : vector<8x96xf32>
    %3 = tpu.matmul %1, %2, %cst {dimension_numbers = #tpu.dot_dimension_numbers<[1], [0], [0], [1], [0, 0, 1, 1], [], []>} : vector<8x32xf32>, vector<32x96xf32>, vector<8x96xf32> -> vector<8x96xf32>
    %c0_4 = arith.constant 0 : index
    %c0_5 = arith.constant 0 : index
    %4 = vector.load %arg4[%c0_4, %c0_5] : memref<1x96xf32, #tpu.memory_space<vmem>>, vector<1x96xf32>
    %5 = vector.shape_cast %4 : vector<1x96xf32> to vector<96xf32>
    %6 = vector.shape_cast %5 : vector<96xf32> to vector<1x96xf32>
    %7 = vector.broadcast %6 : vector<1x96xf32> to vector<8x96xf32>
    %8 = arith.addf %3, %7 : vector<8x96xf32>
    %9 = vector.extract_strided_slice %8 {offsets = [0, 0], sizes = [8, 32], strides = [1, 1]} : vector<8x96xf32> to vector<8x32xf32>
    %10 = vector.shape_cast %9 : vector<8x32xf32> to vector<8x4x8xf32>
    %11 = tpu.transpose %10, [1, 0, 2] : vector<8x4x8xf32> -> vector<4x8x8xf32>
    %c0_6 = arith.constant 0 : index
    %c0_7 = arith.constant 0 : index
    %c0_8 = arith.constant 0 : index
    %c0_9 = arith.constant 0 : index
    %12 = vector.load %arg5[%c0_6, %c0_7, %c0_8, %c0_9] : memref<1x4x8x8xf32, #tpu.memory_space<vmem>>, vector<1x4x8x8xf32>
    %13 = vector.shape_cast %12 : vector<1x4x8x8xf32> to vector<4x8x8xf32>
    %14 = vector.shape_cast %11 : vector<4x8x8xf32> to vector<1x4x8x8xf32>
    tpu.vector_store %arg5[%c0_6, %c0_7, %c0_8, %c0_9], %14 {strides = array<i32>} : memref<1x4x8x8xf32, #tpu.memory_space<vmem>>, vector<1x4x8x8xf32>,
    %15 = vector.extract_strided_slice %8 {offsets = [0, 32], sizes = [8, 32], strides = [1, 1]} : vector<8x96xf32> to vector<8x32xf32>
    %16 = vector.shape_cast %15 : vector<8x32xf32> to vector<8x4x8xf32>
    %17 = tpu.transpose %16, [1, 0, 2] : vector<8x4x8xf32> -> vector<4x8x8xf32>
    %c0_10 = arith.constant 0 : index
    %c0_11 = arith.constant 0 : index
    %c0_12 = arith.constant 0 : index
    %c0_13 = arith.constant 0 : index
    %18 = vector.load %arg6[%c0_10, %c0_11, %c0_12, %c0_13] : memref<1x4x8x8xf32, #tpu.memory_space<vmem>>, vector<1x4x8x8xf32>
    %19 = vector.shape_cast %18 : vector<1x4x8x8xf32> to vector<4x8x8xf32>
    %20 = vector.shape_cast %17 : vector<4x8x8xf32> to vector<1x4x8x8xf32>
    tpu.vector_store %arg6[%c0_10, %c0_11, %c0_12, %c0_13], %20 {strides = array<i32>} : memref<1x4x8x8xf32, #tpu.memory_space<vmem>>, vector<1x4x8x8xf32>,
    %21 = vector.extract_strided_slice %8 {offsets = [0, 64], sizes = [8, 32], strides = [1, 1]} : vector<8x96xf32> to vector<8x32xf32>
    %22 = vector.shape_cast %21 : vector<8x32xf32> to vector<8x4x8xf32>
    %23 = tpu.transpose %22, [1, 0, 2] : vector<8x4x8xf32> -> vector<4x8x8xf32>
    %c0_14 = arith.constant 0 : index
    %c0_15 = arith.constant 0 : index
    %c0_16 = arith.constant 0 : index
    %c0_17 = arith.constant 0 : index
    %24 = vector.load %arg7[%c0_14, %c0_15, %c0_16, %c0_17] : memref<1x4x8x8xf32, #tpu.memory_space<vmem>>, vector<1x4x8x8xf32>
    %25 = vector.shape_cast %24 : vector<1x4x8x8xf32> to vector<4x8x8xf32>
    %26 = vector.shape_cast %23 : vector<4x8x8xf32> to vector<1x4x8x8xf32>
    tpu.vector_store %arg7[%c0_14, %c0_15, %c0_16, %c0_17], %26 {strides = array<i32>} : memref<1x4x8x8xf32, #tpu.memory_space<vmem>>, vector<1x4x8x8xf32>,
    return
  }
  func.func @transform_0(%arg0: i32, %arg1: i32) -> (i32, i32, i32) {
    %c0_i32 = arith.constant 0 : i32
    %c0_i32_0 = arith.constant 0 : i32
    return %arg0, %arg1, %c0_i32 : i32, i32, i32
  }
  func.func @transform_1(%arg0: i32, %arg1: i32) -> (i32, i32) {
    %c0_i32 = arith.constant 0 : i32
    %c0_i32_0 = arith.constant 0 : i32
    %c0_i32_1 = arith.constant 0 : i32
    return %c0_i32, %c0_i32_0 : i32, i32
  }
  func.func @transform_2(%arg0: i32, %arg1: i32) -> (i32, i32) {
    %c0_i32 = arith.constant 0 : i32
    %c0_i32_0 = arith.constant 0 : i32
    %c0_i32_1 = arith.constant 0 : i32
    return %c0_i32, %c0_i32_0 : i32, i32
  }
  func.func @transform_3(%arg0: i32, %arg1: i32) -> (i32, i32, i32, i32) {
    %c0_i32 = arith.constant 0 : i32
    %c0_i32_0 = arith.constant 0 : i32
    %c0_i32_1 = arith.constant 0 : i32
    return %arg0, %c0_i32, %arg1, %c0_i32_0 : i32, i32, i32, i32
  }
  func.func @transform_4(%arg0: i32, %arg1: i32) -> (i32, i32, i32, i32) {
    %c0_i32 = arith.constant 0 : i32
    %c0_i32_0 = arith.constant 0 : i32
    %c0_i32_1 = arith.constant 0 : i32
    return %arg0, %c0_i32, %arg1, %c0_i32_0 : i32, i32, i32, i32
  }
  func.func @transform_5(%arg0: i32, %arg1: i32) -> (i32, i32, i32, i32) {
    %c0_i32 = arith.constant 0 : i32
    %c0_i32_0 = arith.constant 0 : i32
    %c0_i32_1 = arith.constant 0 : i32
    return %arg0, %c0_i32, %arg1, %c0_i32_0 : i32, i32, i32, i32
  }
}

</mosaic_0001>

<bundles_post_ra>
// kernel: tpu_custom_call.1
= control target key start
LH: loop header
LB: loop body
LE: loop exit
PB: predicated region body
PF: predicated region fallthrough
CT: control target
= control target key end

     0   :  { %11 = vsyncpa [#allocation3], 0  ;;  %s1832_s0 = inlined_call_operand.hbm [shape: f32[2,8,32], index: 0, kind: input, shape index: {}]   ;;  %s1833_s1 = inlined_call_operand.hbm [shape: f32[32,96], index: 1, kind: input, shape index: {}]   ;;  %s1834_s2 = inlined_call_operand.vmem [shape: f32[1,96], index: 2, kind: input, shape index: {}]   ;;  %s1835_s3 = inlined_call_operand.hbm [shape: f32[2,4,8,8], index: 3, kind: output, shape index: {0}]   ;;  %s1836_s4 = inlined_call_operand.hbm [shape: f32[2,4,8,8], index: 4, kind: output, shape index: {1}]   ;;  %s1837_s5 = inlined_call_operand.hbm [shape: f32[2,4,8,8], index: 5, kind: output, shape index: {2}]  }
   0x1   :  { %13 = vsyncpa [#allocation3 + $0x1], 0 }
   0x2   :  { %14 = vsyncpa [#allocation6], 0 }
   0x3   :  { %15 = vsyncpa [#allocation4], 0 }
   0x4   :  { %17 = vsyncpa [#allocation4 + $0x1], 0 }
   0x5   :  { %18 = vsyncpa [#allocation9], 0 }
   0x6   :  { %20 = vsyncpa [#allocation9 + $0x1], 0  ;;  %s1462_s18 = smov 0   ;;  %s1464_s19 = smov 0  }
   0x7   :  { %s1466_s20 = smov 0   ;;  %s1468_s21 = smov 0  }
   0x8   :  { %s1470_s22 = smov 0   ;;  %s1472_s23 = smov 0  }
   0x9 LB: > { %s1493_s24 = sadd.s32 4294967295, %s1411_s23   ;;  %s1841_s25 = sadd.s32 4294967294, %s1411_s23   ;;  %s1411_s23 = sphi %s1472_s23, %s26_s23   ;;  %s1407_s22 = sphi %s1470_s22, %s1861_s22   ;;  %s1403_s21 = sphi %s1468_s21, %s1860_s21   ;;  %s1399_s20 = sphi %s1466_s20, %s1859_s20   ;;  %s1395_s19 = sphi %s1464_s19, %s1858_s19   ;;  %s1391_s18 = sphi %s1462_s18, %s1857_s18  }
   0xa   : > { %p60_p0 = scmp.ne.s32.totalorder %s1395_s19, %s1391_s18  ;;  %p1838_p1 = scmp.eq.s32.totalorder %s1493_s24, 0 }
   0xb   : > { %p134_p3 = scmp.eq.s32.totalorder %s1841_s25, 1  ;;  %p1055_p5 = scmp.ge.s32.totalorder %s1411_s23, 1 }
   0xc   : > { %p1504_p4 = por %p1838_p1, %p60_p0  ;;  %p197_p7 = scmp.lt.s32.totalorder %s1411_s23, 3 }
   0xd   : > { %p1509_p6 = por %p134_p3, %p60_p0  ;;  %s1413_s29 = smov [#allocation5]  }
   0xe   : > { %s1842_s26 = scalar_select %p1504_p4, 1, 0 }
   0xf   : > { %s1843_s27 = scalar_select %p1509_p6, 1, 0 }
  0x10   : > { %p1514_p8 = pnand %p1055_p5, %p197_p7  ;;  %s209_s30 = sshll.u32 %s1413_s29, 4  ;;  %s210_s30 = int_to_ptr.vmem [resolvable:$true] %s209_s30 }
  0x11   : > { %s38_s7 = sadd.s32 1, %s1407_s22  ;;  %s1207_s10 = scalar_lea.hbm %s1833_s1, 512 }
  0x12   : > { %s1844_s28 = scalar_select %p1514_p8, 1, 0 }
  0x13   : > { %p1122_p9 = pneg %p1514_p8  ;;  %p1208_p12 = scmp.ne.s32.totalorder %s1833_s1, %s1207_s10 }
  0x14   : > { %p1214_p5 = scmp.lt.u32.totalorder %s1207_s10, %s1833_s1 }
  0x15   : > { %p1523_p11 = pnand %p1122_p9, %p1838_p1 }
  0x17   : > { %p1209_p13 = pneg %p1523_p11 }
  0x19   : > { %p1210_p0 = pnand %p1209_p13, %p1208_p12 }
  0x1b   : > { %p1211_p3 = pneg %p1210_p0 }
  0x1d   : > { %p1216_p7 = pnand %p1214_p5, %p1211_p3 }
  0x1f   : > { %1219 = shalt.err (!%p1216_p7)
}
  0x20   : > { %s1220_s15 = scalar_lea.vmem %s210_s30, 512  ;;  %p1228_p2 = scmp.lt.s32.totalorder %s210_s30, %s210_s30 }
  0x21   : > { %p1221_p9 = scmp.ne.s32.totalorder %s210_s30, %s1220_s15  ;;  %p1229_p6 = scmp.lt.s32.totalorder %s1220_s15, %s1220_s15 }
  0x23   : > { %p1223_p10 = pnand %p1221_p9, %p1209_p13  ;;  %p1230_p4 = por %p1229_p6, %p1228_p2 }
  0x25   : > { %p1224_p1 = pneg %p1223_p10 }
  0x27   : > { %p1231_p8 = pnand %p1230_p4, %p1224_p1 }
  0x29   : > { %1234 = shalt.err (!%p1231_p8)
}
  0x2a   : > { %s1414_s16 = smov 128   ;;  %s1415_s17 = smov 8  }
  0x2b   : > { %1125 = dma.hbm_to_vmem [thread:$0]  (!%p1523_p11), %s1833_s1, 512, %s210_s30, [#allocation6], %s1414_s16, %s1414_s16, %s1415_s17  }
  0x2c   : > { %p40_p1 = scmp.ge.s32.totalorder %s38_s7, 2  ;;  %s47_s9 = sadd.s32 1, %s1399_s20 }
  0x2d   : > { %p54_p2 = scmp.ne.s32.totalorder %s1399_s20, %s1395_s19  ;;  %p55_p4 = scmp.eq.s32.totalorder %s1411_s23, 0 }
  0x2e   : > { %s1863_s7 = smov (%p40_p1, %s38_s7), 0  ;;  %p1847_p8 = scmp.eq.s32.totalorder %s1493_s24, 1 }
  0x2f   : > { %p1550_p6 = por %p55_p4, %p54_p2  ;;  %s42_s6 = ssub.s32 %s1407_s22, %s1863_s7 }
  0x30   : > { %p1556_p10 = por %p1847_p8, %p54_p2  ;;  %p1141_p12 = scmp.lt.s32.totalorder %s1411_s23, 2 }
  0x31   : > { %p45_p11 = scmp.eq.s32.totalorder %s42_s6, 0  ;;  %s226_s30 = sand.u32 1, %s1399_s20  }
  0x32   : > { %s1058_s12 = sshll.u32 %s226_s30, 3  ;;  %s1059_s14 = sshll.u32 %s1407_s22, 7 }
  0x33   : > { %s1565_s13 = scalar_select %p45_p11, %s1399_s20, %s47_s9  }
  0x34   : > { %s1571_s17 = scalar_lea.hbm %s1832_s0, %s1059_s14  ;;  %s230_s29 = scalar_lea.vmem [#allocation2], %s1058_s12 }
  0x35   : > { %s238_s8 = sshll.u32 %s230_s29, 4  ;;  %p1577_p13 = pnand %p1141_p12, %p1550_p6  ;;  %s1573_s8 = int_to_ptr.vmem [resolvable:$true] %s238_s8 }
  0x36   : > { %s227_s9 = scalar_lea.sflag [#allocation3], %s226_s30  ;;  %s1235_s25 = scalar_lea.hbm %s1571_s17, 128 }
  0x37   : > { %p1236_p0 = scmp.ne.s32.totalorder %s1571_s17, %s1235_s25  ;;  %p1237_p3 = pneg %p1577_p13 }
  0x38   : > { %s1240_s15 = scalar_lea.hbm %s1832_s0, 256  ;;  %p1241_p9 = scmp.lt.u32.totalorder %s1571_s17, %s1832_s0 }
  0x39   : > { %p1238_p5 = pnand %p1237_p3, %p1236_p0  ;;  %p1242_p1 = scmp.lt.u32.totalorder %s1240_s15, %s1235_s25 }
  0x3a   : > { %p1244_p4 = scmp.lt.u32.totalorder %s1235_s25, %s1571_s17 }
  0x3b   : > { %p1239_p7 = pneg %p1238_p5  ;;  %p1243_p2 = por %p1242_p1, %p1241_p9 }
  0x3d   : > { %p1245_p6 = por %p1244_p4, %p1243_p2 }
  0x3f   : > { %p1246_p8 = pnand %p1245_p6, %p1239_p7 }
  0x41   : > { %1249 = shalt.err (!%p1246_p8)
}
  0x42   : > { %s1250_s30 = scalar_lea.vmem %s1573_s8, 128  ;;  %s1416_s29 = smov [#allocation2]  }
  0x43   : > { %p1251_p12 = scmp.ne.s32.totalorder %s1573_s8, %s1250_s30  ;;  %s1255_s12 = sshll.u32 %s1416_s29, 4  ;;  %s1256_s12 = int_to_ptr.vmem [resolvable:$false] %s1255_s12 }
  0x44   : > { %s1257_s14 = scalar_lea.vmem %s1256_s12, 256  ;;  %p1258_p5 = scmp.lt.s32.totalorder %s1573_s8, %s1256_s12 }
  0x45   : > { %p1253_p11 = pnand %p1251_p12, %p1237_p3  ;;  %p1259_p9 = scmp.lt.s32.totalorder %s1257_s14, %s1250_s30 }
  0x47   : > { %p1254_p0 = pneg %p1253_p11  ;;  %p1260_p1 = por %p1259_p9, %p1258_p5 }
  0x49   : > { %p1261_p2 = pnand %p1260_p1, %p1254_p0 }
  0x4b   : > { %1264 = shalt.err (!%p1261_p2)
}
  0x4c   : > { %1129 = dma.hbm_to_vmem [thread:$0]  (!%p1577_p13), %s1571_s17, 128, %s1573_s8, %s227_s9  }
  0x4d   : > { %p1850_p7 = scmp.ne.s32.totalorder %s1844_s28, 0 }
  0x4e   : > { %s1609_s25 = sand.u32 (!%p1850_p7), 1, %s1395_s19   ;;  %p1851_p3 = scmp.ne.s32.totalorder (!%p1850_p7), %s1842_s26, 0 }
  0x4f   : > { %247 = sbr.rel (%p1850_p7) target bundleno = 606 (0x25e), region = 32  ;;  %s1061_s15 = sshll.u32 (!%p1850_p7), %s1609_s25, 3 }
  0x50   : > { %s250_s10 = scalar_lea.sflag (!%p1850_p7), [#allocation3], %s1609_s25  ;;  %s253_s16 = scalar_lea.vmem (!%p1850_p7), [#allocation2], %s1061_s15 }
  0x56   : > { %1374 = dma.done.wait (%p1851_p3), %s250_s10, 128  }
  0x57   : > { %1376 = vsyncadd (%p1851_p3), %s250_s10, 4294967168  ;;  %p1852_p4 = scmp.eq.s32.totalorder %s1493_s24, 0 }
  0x59   : > { %1378 = dma.done.wait (%p1852_p4), [#allocation6], 512   ;;  %p1853_p13 = pmov %p1852_p4 }
  0x5a   : > { %v1417_v0 = vmov 0.0|0.0   ;;  %vm1418_vm0 = vmmov 0   ;;  %v1419_v1 = vmov 0.0   ;;  %v295_v2 = vld [vmem:[#allocation5] sm:$0xff]  ;;  %v296_v3 = vld [vmem:[#allocation5 + $0x8] sm:$0xff]  ;;  %v297_v4 = vld [vmem:[#allocation5 + $0x10] sm:$0xff]  ;;  %v395_v15 = vlaneseq }
  0x5b   : > { %1380 = vsyncadd (%p1853_p13), [#allocation6], 4294966784  ;;  %1104 = vmatprep.subr.bf16.mxu0 %v1417_v0  ;;  %1101 = vmatprep.mubr.msk.f32.mxu0 %vm1418_vm0, %v1419_v1  ;;  %v1105_v5 = vpack.c.bf16 %v296_v3, %v295_v2  ;;  %v298_v6 = vld [vmem:[#allocation5 + $0x18] sm:$0xff]  ;;  %vm306_vm1 = vcmask 261120   ;;  %v1066_v9 = vld [vmem:[%s1834_s2] ss:$0 sm:$0xff] }
  0x5c   : > { %v1108_v7 = vpack.c.bf16 %v298_v6, %v297_v4  ;;  %v294_v8 = vld [vmem:[%s253_s16] sm:$0xff]  ;;  %s1420_s17 = smov 104   ;;  %s1421_s8 = smov 120   ;;  %v1425_v13 = vmov 1983009808   ;;  %v396_v19 = vshrl.u32 %v395_v15, 7 }
  0x5d   : > { %1106 = vmatpush3.bf16.msra.mxu0 %v1105_v5  ;;  %s1422_s6 = smov 96   ;;  %s1423_s9 = smov 112   ;;  %v393_v14 = vunpack.c.l.s4 %v1425_v13  ;;  %v1426_v16 = vmov 1934713408   ;;  %vm526_vm2 = vcmask 64512  }
  0x5e   : > { %1107 = vmatprep.subr.bf16.mxu0 %v1417_v0  ;;  %s1424_s30 = smov 64   ;;  %v425_v17 = vunpack.c.l.s4 %v1426_v16  ;;  %s1645_s29 = sshll.u32 %s1609_s25, 5 }
  0x5f   : > { %v394_v18 = vunpack.c.0.s8 %v393_v14  ;;  %s1652_s12 = sshll.u32 %s1403_s21, 9  ;;  %s279_s16 = scalar_lea.vmem [#allocation7], %s1645_s29 }
  0x60   : > { %v426_v22 = vunpack.c.0.s8 %v425_v17  ;;  %s1658_s10 = scalar_lea.hbm %s1835_s3, %s1652_s12  ;;  %s860_s26 = sshll.u32 %s279_s16, 4  ;;  %s1665_s26 = int_to_ptr.vmem [resolvable:$true] %s860_s26 }
  0x61   : > { %1109 = vmatpush3.bf16.msra.mxu0 %v1108_v7  ;;  %v1625_v23 = vsub.s32 %v394_v18, %v396_v19  ;;  %s836_s21 = scalar_lea.sflag [#allocation4], %s1609_s25  ;;  %s1265_s28 = scalar_lea.vmem %s1665_s26, 512 }
  0x62   : > { %v1627_v29 = vsub.s32 %v426_v22, %v396_v19  ;;  %p1266_p6 = scmp.ne.s32.totalorder %s1665_s26, %s1265_s28 }
  0x64   : > { %1102 = vmatmul.mubr.msk.f32.vlgmr.msra.gmra.mrb[0].mxu0 %vm306_vm1, %v294_v8  ;;  %p1267_p8 = pnand %p1266_p6, %p1556_p10 }
  0x66   : > { %p1268_p12 = pneg %p1267_p8 }
 0x137   : > { %v376_v10 = vpop.f32.mrb[0].mxu0 }
 0x138   : > { %v377_v11 = vadd.f32 %v1066_v9, %v376_v10  ;;  %v1103_v12 = vpop.f32.mrb[1].mxu0 }
 0x13a   : > { %387 = vrot.lane.b32.xlu1 %v377_v11, %s1420_s17  ;;  %381 = vrot.lane.b32.xlu0 %v377_v11, %s1421_s8  ;;  %s1427_s17 = smov [#allocation7]  }
 0x13b   : > { %s1269_s8 = sshll.u32 %s1427_s17, 4  ;;  %s1270_s8 = int_to_ptr.vmem [resolvable:$false] %s1269_s8 }
 0x13c   : > { %p1272_p11 = scmp.lt.s32.totalorder %s1665_s26, %s1270_s8 }
 0x13e   : > { %531 = vrot.lane.b32.xlu1 %v377_v11, %s1422_s6  ;;  %384 = vrot.lane.b32.xlu0 %v377_v11, %s1423_s9 }
 0x142   : > { %683 = vrot.lane.b32.xlu1 %v377_v11, %s1424_s30 }
 0x1ac   : > { %v388_v20 = vpop.permute.xlu1 %387  ;;  %v382_v21 = vpop.permute.xlu0 %381 }
 0x1ad   : > { %533 = vrot.lane.b32.xlu0 %v382_v21, %s1422_s6  ;;  %v406_v24 = vcombine.low %v382_v21, %v388_v20  ;;  %v407_v25 = vcombine.high %v382_v21, %v388_v20 }
 0x1af   : > { %v414_v30 = vrot.slane %v406_v24, %v1625_v23  ;;  %v421_v31 = vrot.slane %v407_v25, %v1625_v23 }
 0x1b0   : > { %v385_v26 = vpop.permute.xlu0 %384 }
 0x1b1   : > { %v390_v27 = vcombine.low %v377_v11, %v385_v26  ;;  %v391_v28 = vcombine.high %v377_v11, %v385_v26  ;;  %537 = vrot.lane.b32.xlu0 %v388_v20, %s1422_s6  ;;  %535 = vrot.lane.b32.xlu1 %v385_v26, %s1422_s6  ;;  %s1271_s6 = scalar_lea.vmem %s1270_s8, 1024 }
 0x1b2   : > { %p1273_p0 = scmp.lt.s32.totalorder %s1271_s6, %s1265_s28 }
 0x1b3   : > { %v398_v32 = vrot.slane %v390_v27, %v1625_v23  ;;  %v405_v33 = vrot.slane %v391_v28, %v1625_v23 }
 0x1b4   : > { %p1274_p5 = por %p1273_p0, %p1272_p11 }
 0x1b5   : > { %v422_v34 = vcombine.low %v398_v32, %v414_v30  ;;  %v423_v35 = vcombine.high %v398_v32, %v414_v30  ;;  %v438_v36 = vcombine.low %v405_v33, %v421_v31  ;;  %v439_v37 = vcombine.high %v405_v33, %v421_v31  ;;  %685 = vrot.lane.b32.xlu0 %v382_v21, %s1424_s30 }
 0x1b6   : > { %687 = vrot.lane.b32.xlu1 %v385_v26, %s1424_s30  ;;  %p1275_p9 = pnand %p1274_p5, %p1268_p12 }
 0x1b7   : > { %v430_v38 = vrot.slane %v422_v34, %v1627_v29  ;;  %v437_v39 = vrot.slane %v423_v35, %v1627_v29  ;;  %v446_v40 = vrot.slane %v438_v36, %v1627_v29  ;;  %v453_v41 = vrot.slane %v439_v37, %v1627_v29 }
 0x1b9   : > { %v458_v42 = vcombine.low %v430_v38, %v437_v39  ;;  %v1068_v43 = vcombine.high %v430_v38, %v437_v39  ;;  %v474_v44 = vcombine.low %v446_v40, %v453_v41  ;;  %v1069_v45 = vcombine.high %v446_v40, %v453_v41  ;;  %689 = vrot.lane.b32.xlu0 %v388_v20, %s1424_s30 }
 0x1bb   : > { %v465_v46 = vrot.slane %v458_v42, %v1625_v23  ;;  %v473_v47 = vrot.slane %v1068_v43, %v1625_v23  ;;  %v481_v48 = vrot.slane %v474_v44, %v1625_v23  ;;  %v489_v49 = vrot.slane %v1069_v45, %v1625_v23 }
 0x1bd   : > { %v490_v50 = vcombine.low %v465_v46, %v473_v47  ;;  %v491_v51 = vcombine.high %v465_v46, %v473_v47  ;;  %v506_v52 = vcombine.low %v481_v48, %v489_v49  ;;  %v507_v53 = vcombine.high %v481_v48, %v489_v49 }
 0x1bf   : > { %v498_v54 = vrot.slane %v490_v50, %v1627_v29  ;;  %v505_v55 = vrot.slane %v491_v51, %v1627_v29  ;;  %v514_v56 = vrot.slane %v506_v52, %v1627_v29  ;;  %v521_v57 = vrot.slane %v507_v53, %v1627_v29 }
 0x1c1   : > { %v522_v58 = vcombine.low %v498_v54, %v514_v56  ;;  %v523_v59 = vcombine.high %v498_v54, %v514_v56  ;;  %v524_v60 = vcombine.low %v505_v55, %v521_v57  ;;  %v525_v61 = vcombine.high %v505_v55, %v521_v57 }
 0x1c3   : > { %527 = vst.msk [vmem:[%s279_s16] sm:$0xff] %vm526_vm2, %v522_v58  ;;  %528 = vst.msk [vmem:[%s279_s16 + $0x8] sm:$0xff] %vm526_vm2, %v523_v59 }
 0x1c4   : > { %529 = vst.msk [vmem:[%s279_s16 + $0x10] sm:$0xff] %vm526_vm2, %v524_v60  ;;  %530 = vst.msk [vmem:[%s279_s16 + $0x18] sm:$0xff] %vm526_vm2, %v525_v61 }
 0x1c5   : > { %1278 = shalt.err (!%p1275_p9)
}
 0x1c6   : > { %s1279_s9 = scalar_lea.hbm %s1658_s10, 512  ;;  %s1283_s15 = scalar_lea.hbm %s1835_s3, 1024 }
 0x1c7   : > { %p1280_p1 = scmp.ne.s32.totalorder %s1658_s10, %s1279_s9  ;;  %p1284_p3 = scmp.lt.u32.totalorder %s1658_s10, %s1835_s3 }
 0x1c8   : > { %p1285_p4 = scmp.lt.u32.totalorder %s1283_s15, %s1279_s9  ;;  %p1287_p6 = scmp.lt.u32.totalorder %s1279_s9, %s1658_s10 }
 0x1c9   : > { %p1281_p2 = pnand %p1280_p1, %p1556_p10 }
 0x1ca   : > { %p1286_p13 = por %p1285_p4, %p1284_p3 }
 0x1cb   : > { %p1282_p7 = pneg %p1281_p2 }
 0x1cc   : > { %p1288_p8 = por %p1287_p6, %p1286_p13 }
 0x1ce   : > { %p1289_p12 = pnand %p1288_p8, %p1282_p7 }
 0x1d0   : > { %1292 = shalt.err (!%p1289_p12)
}
 0x1d1   : > { %s1428_s28 = smov 128   ;;  %s1429_s8 = smov 8   ;;  %v532_v62 = vpop.permute.xlu1 %531 }
 0x1d2   : > { %1116 = dma.vmem_to_hbm [thread:$0]  (%p1556_p10), %s1665_s26, 512, %s1658_s10, %s836_s21, %s1428_s28, %s1428_s28, %s1429_s8  }
 0x1d3   : > { %s840_s25 = sand.u32 1, %s1493_s24   ;;  %s286_s10 = scalar_lea.vmem [#allocation8], %s1645_s29 }
 0x1d4   : > { %s877_s26 = sshll.u32 %s286_s10, 4  ;;  %s1724_s9 = scalar_lea.hbm %s1836_s4, %s1652_s12  ;;  %s1726_s26 = int_to_ptr.vmem [resolvable:$true] %s877_s26 }
 0x1d5   : > { %v684_v63 = vpop.permute.xlu1 %683  ;;  %s1738_s30 = scalar_lea.sflag [#allocation9], %s840_s25  ;;  %s1293_s14 = scalar_lea.vmem %s1726_s26, 512 }
 0x1d6   : > { %p1294_p11 = scmp.ne.s32.totalorder %s1726_s26, %s1293_s14  ;;  %s1430_s15 = smov [#allocation8]  }
 0x1d7   : > { %s1297_s16 = sshll.u32 %s1430_s15, 4  ;;  %s1298_s16 = int_to_ptr.vmem [resolvable:$false] %s1297_s16 }
 0x1d8   : > { %p1295_p0 = pnand %p1294_p11, %p1556_p10  ;;  %s1299_s17 = scalar_lea.vmem %s1298_s16, 1024 }
 0x1d9   : > { %p1300_p9 = scmp.lt.s32.totalorder %s1726_s26, %s1298_s16  ;;  %p1301_p1 = scmp.lt.s32.totalorder %s1299_s17, %s1293_s14 }
 0x1da   : > { %p1296_p5 = pneg %p1295_p0 }
 0x1db   : > { %p1302_p2 = por %p1301_p1, %p1300_p9 }
 0x1dd   : > { %p1303_p7 = pnand %p1302_p2, %p1296_p5 }
 0x21f   : > { %v534_v0 = vpop.permute.xlu0 %533 }
 0x223   : > { %v536_v1 = vpop.permute.xlu1 %535  ;;  %v538_v2 = vpop.permute.xlu0 %537 }
 0x224   : > { %v543_v3 = vcombine.low %v532_v62, %v536_v1  ;;  %v544_v4 = vcombine.high %v532_v62, %v536_v1  ;;  %v559_v5 = vcombine.low %v534_v0, %v538_v2  ;;  %v560_v6 = vcombine.high %v534_v0, %v538_v2 }
 0x226   : > { %v551_v7 = vrot.slane %v543_v3, %v1625_v23  ;;  %v558_v8 = vrot.slane %v544_v4, %v1625_v23  ;;  %v567_v9 = vrot.slane %v559_v5, %v1625_v23  ;;  %v574_v10 = vrot.slane %v560_v6, %v1625_v23 }
 0x227   : > { %v686_v11 = vpop.permute.xlu0 %685 }
 0x228   : > { %v575_v12 = vcombine.low %v551_v7, %v567_v9  ;;  %v576_v13 = vcombine.high %v551_v7, %v567_v9  ;;  %v591_v14 = vcombine.low %v558_v8, %v574_v10  ;;  %v592_v15 = vcombine.high %v558_v8, %v574_v10  ;;  %v688_v16 = vpop.permute.xlu1 %687 }
 0x229   : > { %v695_v21 = vcombine.low %v684_v63, %v688_v16  ;;  %v696_v22 = vcombine.high %v684_v63, %v688_v16 }
 0x22a   : > { %v583_v17 = vrot.slane %v575_v12, %v1627_v29  ;;  %v590_v18 = vrot.slane %v576_v13, %v1627_v29  ;;  %v599_v19 = vrot.slane %v591_v14, %v1627_v29  ;;  %v606_v20 = vrot.slane %v592_v15, %v1627_v29 }
 0x22b   : > { %v690_v24 = vpop.permute.xlu0 %689  ;;  %v703_v36 = vrot.slane %v695_v21, %v1625_v23  ;;  %v710_v37 = vrot.slane %v696_v22, %v1625_v23 }
 0x22c   : > { %v611_v25 = vcombine.low %v583_v17, %v590_v18  ;;  %v1070_v26 = vcombine.high %v583_v17, %v590_v18  ;;  %v627_v27 = vcombine.low %v599_v19, %v606_v20  ;;  %v1071_v28 = vcombine.high %v599_v19, %v606_v20 }
 0x22d   : > { %v711_v30 = vcombine.low %v686_v11, %v690_v24  ;;  %v712_v31 = vcombine.high %v686_v11, %v690_v24 }
 0x22e   : > { %v618_v32 = vrot.slane %v611_v25, %v1625_v23  ;;  %v626_v33 = vrot.slane %v1070_v26, %v1625_v23  ;;  %v634_v34 = vrot.slane %v627_v27, %v1625_v23  ;;  %v642_v35 = vrot.slane %v1071_v28, %v1625_v23 }
 0x22f   : > { %v719_v38 = vrot.slane %v711_v30, %v1625_v23  ;;  %v726_v39 = vrot.slane %v712_v31, %v1625_v23 }
 0x230   : > { %v643_v40 = vcombine.low %v618_v32, %v626_v33  ;;  %v644_v41 = vcombine.high %v618_v32, %v626_v33  ;;  %v659_v42 = vcombine.low %v634_v34, %v642_v35  ;;  %v660_v43 = vcombine.high %v634_v34, %v642_v35 }
 0x231   : > { %v727_v44 = vcombine.low %v703_v36, %v719_v38  ;;  %v728_v45 = vcombine.high %v703_v36, %v719_v38  ;;  %v743_v46 = vcombine.low %v710_v37, %v726_v39  ;;  %v744_v47 = vcombine.high %v710_v37, %v726_v39 }
 0x232   : > { %v651_v48 = vrot.slane %v643_v40, %v1627_v29  ;;  %v658_v49 = vrot.slane %v644_v41, %v1627_v29  ;;  %v667_v50 = vrot.slane %v659_v42, %v1627_v29  ;;  %v674_v51 = vrot.slane %v660_v43, %v1627_v29 }
 0x233   : > { %v735_v52 = vrot.slane %v727_v44, %v1627_v29  ;;  %v742_v53 = vrot.slane %v728_v45, %v1627_v29  ;;  %v751_v54 = vrot.slane %v743_v46, %v1627_v29  ;;  %v758_v55 = vrot.slane %v744_v47, %v1627_v29 }
 0x234   : > { %v675_v56 = vcombine.low %v651_v48, %v667_v50  ;;  %v676_v57 = vcombine.high %v651_v48, %v667_v50  ;;  %v677_v58 = vcombine.low %v658_v49, %v674_v51  ;;  %v678_v59 = vcombine.high %v658_v49, %v674_v51 }
 0x235   : > { %v763_v60 = vcombine.low %v735_v52, %v742_v53  ;;  %v1072_v61 = vcombine.high %v735_v52, %v742_v53  ;;  %v779_v62 = vcombine.low %v751_v54, %v758_v55  ;;  %v1073_v63 = vcombine.high %v751_v54, %v758_v55 }
 0x236   : > { %679 = vst.msk [vmem:[%s286_s10] sm:$0xff] %vm526_vm2, %v675_v56  ;;  %680 = vst.msk [vmem:[%s286_s10 + $0x8] sm:$0xff] %vm526_vm2, %v676_v57 }
 0x237   : > { %681 = vst.msk [vmem:[%s286_s10 + $0x10] sm:$0xff] %vm526_vm2, %v677_v58  ;;  %682 = vst.msk [vmem:[%s286_s10 + $0x18] sm:$0xff] %vm526_vm2, %v678_v59  ;;  %v770_v0 = vrot.slane %v763_v60, %v1625_v23  ;;  %v778_v1 = vrot.slane %v1072_v61, %v1625_v23  ;;  %v786_v2 = vrot.slane %v779_v62, %v1625_v23 }
 0x238   : > { %v794_v3 = vrot.slane %v1073_v63, %v1625_v23 }
 0x239   : > { %1306 = shalt.err (!%p1303_p7)
}
 0x23a   : > { %s1307_s24 = scalar_lea.hbm %s1724_s9, 512  ;;  %s1311_s21 = scalar_lea.hbm %s1836_s4, 1024 }
 0x23b   : > { %p1308_p3 = scmp.ne.s32.totalorder %s1724_s9, %s1307_s24  ;;  %p1312_p6 = scmp.lt.u32.totalorder %s1724_s9, %s1836_s4 }
 0x23c   : > { %p1313_p8 = scmp.lt.u32.totalorder %s1311_s21, %s1307_s24  ;;  %p1315_p11 = scmp.lt.u32.totalorder %s1307_s24, %s1724_s9 }
 0x23d   : > { %p1309_p4 = pnand %p1308_p3, %p1556_p10 }
 0x23e   : > { %p1314_p12 = por %p1313_p8, %p1312_p6 }
 0x23f   : > { %p1310_p13 = pneg %p1309_p4 }
 0x240   : > { %p1316_p0 = por %p1315_p11, %p1314_p12 }
 0x242   : > { %p1317_p5 = pnand %p1316_p0, %p1310_p13 }
 0x244   : > { %1320 = shalt.err (!%p1317_p5)
}
 0x245   : > { %1117 = dma.vmem_to_hbm [thread:$0]  (%p1556_p10), %s1726_s26, 512, %s1724_s9, %s1738_s30, %s1428_s28, %s1428_s28, %s1429_s8   ;;  %v795_v23 = vcombine.low %v770_v0, %v778_v1  ;;  %v796_v4 = vcombine.high %v770_v0, %v778_v1  ;;  %v811_v5 = vcombine.low %v786_v2, %v794_v3  ;;  %v812_v6 = vcombine.high %v786_v2, %v794_v3 }
 0x246   : > { %s293_s14 = scalar_lea.vmem [#allocation10], %s1645_s29  ;;  %s1774_s17 = scalar_lea.hbm %s1837_s5, %s1652_s12 }
 0x247   : > { %s894_s16 = sshll.u32 %s293_s14, 4  ;;  %v803_v7 = vrot.slane %v795_v23, %v1627_v29  ;;  %v810_v8 = vrot.slane %v796_v4, %v1627_v29  ;;  %v819_v9 = vrot.slane %v811_v5, %v1627_v29  ;;  %v826_v10 = vrot.slane %v812_v6, %v1627_v29  ;;  %s1431_s12 = smov [#allocation10]   ;;  %s1776_s16 = int_to_ptr.vmem [resolvable:$true] %s894_s16 }
 0x248   : > { %s1321_s29 = scalar_lea.vmem %s1776_s16, 512  ;;  %s1325_s24 = sshll.u32 %s1431_s12, 4  ;;  %s1326_s24 = int_to_ptr.vmem [resolvable:$false] %s1325_s24 }
 0x249   : > { %v827_v11 = vcombine.low %v803_v7, %v819_v9  ;;  %v828_v12 = vcombine.high %v803_v7, %v819_v9  ;;  %v829_v13 = vcombine.low %v810_v8, %v826_v10  ;;  %v830_v14 = vcombine.high %v810_v8, %v826_v10  ;;  %p1322_p9 = scmp.ne.s32.totalorder %s1776_s16, %s1321_s29  ;;  %s1327_s25 = scalar_lea.vmem %s1326_s24, 1024 }
 0x24a   : > { %p1328_p7 = scmp.lt.s32.totalorder %s1776_s16, %s1326_s24  ;;  %p1329_p3 = scmp.lt.s32.totalorder %s1327_s25, %s1321_s29 }
 0x24b   : > { %831 = vst.msk [vmem:[%s293_s14] sm:$0xff] %vm526_vm2, %v827_v11  ;;  %832 = vst.msk [vmem:[%s293_s14 + $0x8] sm:$0xff] %vm526_vm2, %v828_v12  ;;  %p1323_p1 = pnand %p1322_p9, %p1556_p10 }
 0x24c   : > { %833 = vst.msk [vmem:[%s293_s14 + $0x10] sm:$0xff] %vm526_vm2, %v829_v13  ;;  %834 = vst.msk [vmem:[%s293_s14 + $0x18] sm:$0xff] %vm526_vm2, %v830_v14  ;;  %p1330_p4 = por %p1329_p3, %p1328_p7 }
 0x24d   : > { %p1324_p2 = pneg %p1323_p1 }
 0x24f   : > { %p1331_p13 = pnand %p1330_p4, %p1324_p2 }
 0x251   : > { %1334 = shalt.err (!%p1331_p13)
}
 0x252   : > { %s1335_s10 = scalar_lea.hbm %s1774_s17, 512  ;;  %s1339_s15 = scalar_lea.hbm %s1837_s5, 1024 }
 0x253   : > { %p1336_p6 = scmp.ne.s32.totalorder %s1774_s17, %s1335_s10  ;;  %p1340_p11 = scmp.lt.u32.totalorder %s1774_s17, %s1837_s5 }
 0x254   : > { %p1341_p0 = scmp.lt.u32.totalorder %s1339_s15, %s1335_s10  ;;  %p1343_p9 = scmp.lt.u32.totalorder %s1335_s10, %s1774_s17 }
 0x255   : > { %p1337_p8 = pnand %p1336_p6, %p1556_p10 }
 0x256   : > { %p1342_p5 = por %p1341_p0, %p1340_p11 }
 0x257   : > { %p1338_p12 = pneg %p1337_p8 }
 0x258   : > { %p1344_p1 = por %p1343_p9, %p1342_p5 }
 0x25a   : > { %p1345_p2 = pnand %p1344_p1, %p1338_p12 }
 0x25c   : > { %1348 = shalt.err (!%p1345_p2)
}
 0x25d   : > { %1118 = dma.vmem_to_hbm [thread:$0]  (%p1556_p10), %s1776_s16, 512, %s1774_s17, %s1738_s30, %s1428_s28, %s1428_s28, %s1429_s8  }
 0x25e PF: > { %s909_s9 = sand.u32 1, %s1391_s18   ;;  %p1854_p7 = scmp.ne.s32.totalorder %s1843_s27, 0 }
 0x25f   : > { %p1855_p3 = scmp.ge.s32.totalorder %s1411_s23, 2  ;;  %s910_s29 = scalar_lea.sflag [#allocation4], %s909_s9 }
 0x261   : > { %p1131_p4 = pnand %p1855_p3, %p1854_p7 }
 0x263   : > { %1382 = dma.done.wait (!%p1131_p4), %s910_s29, 512  }
 0x264   : > { %1384 = vsyncadd (!%p1131_p4), %s910_s29, 4294966784  ;;  %s1856_s11 = sadd.s32 4294967294, %s1411_s23  }
 0x265   : > { %s918_s12 = sand.u32 1, %s1856_s11  }
 0x266   : > { %s919_s24 = scalar_lea.sflag [#allocation9], %s918_s12 }
 0x267   : > { %1386 = dma.done.wait (!%p1131_p4), %s919_s24, 1024  }
 0x268   : > { %1388 = vsyncadd (!%p1131_p4), %s919_s24, 4294966272  ;;  %s26_s23 = sadd.s32 1, %s1411_s23   ;;  %s1857_s18 = smov %s1395_s19 }
 0x269   : > { %p23_p10 = scmp.ge.s32.totalorder %s26_s23, 4   ;;  %s1858_s19 = smov %s1399_s20 }
 0x26a   : > { %s1859_s20 = smov %s1565_s13  ;;  %s1860_s21 = smov %s1407_s22 }
 0x26b   : > { %s1861_s22 = smov %s1863_s7  ;;  %25 = sbr.rel (!%p23_p10) target bundleno = 9 (0x9), region = 113 }
 0x272   :  { %933 = vsyncpa [#allocation3], 1 }
 0x273   :  { %935 = vsyncpa [#allocation3 + $0x1], 1 }
 0x274   :  { %936 = vsyncpa [#allocation6], 1 }
 0x275   :  { %937 = vsyncpa [#allocation4], 1 }
 0x276   :  { %939 = vsyncpa [#allocation4 + $0x1], 1 }
 0x277   :  { %940 = vsyncpa [#allocation9], 1 }
 0x278   :  { %942 = vsyncpa [#allocation9 + $0x1], 1 }

</bundles_post_ra>
